<compile_context>
chip_gen: v7x
topology: tpu7x:2x2x1
jax: 0.10.0
libtpu: 0.0.40
codegen_flags: <defaults>
</compile_context>

<pallas_src>
import functools
import math

import jax
import jax.numpy as jnp
from jax import lax
from jax.experimental import pallas as pl
from jax.experimental.pallas import tpu as pltpu


_VMEM_LIMIT = 40 * 1024 * 1024   # v7x has 64 MiB / TC -> leave headroom


def _round_up(a, b):
    return ((a + b - 1) // b) * b


# ----------------------------------------------------------------------------
# Kernel A: offset_conv + modulator_conv fused into one 3x3 conv, with the
# clamp(+-max_offset) and 2*sigmoid applied in-kernel.  Grid = (N,).  Each tap
# is a static shifted slice of the shared zero-padded flat x (column-wrap
# masked) and accumulates directly into the (C_om_p, P_pad) output value (no
# scratch round trip, per review micro-fix).
# ----------------------------------------------------------------------------
def _offmod_kernel(x_ref, w_ref, b_ref, out_ref, *, K, pad, W, P_pad, halo,
                   max_offset):
    KK = K * K
    C_om_p = out_ref.shape[0]
    p_idx = lax.broadcasted_iota(jnp.int32, (1, P_pad), 1)
    wo = p_idx % W

    acc = jnp.zeros((C_om_p, P_pad), jnp.float32)
    for k in range(KK):                                   # static unroll (KK=9)
        kh, kw = k // K, k % K
        start = halo + (kh - pad) * W + (kw - pad)        # static, >= 0
        g = x_ref[:, start:start + P_pad].astype(jnp.float32)
        wcol = wo + (kw - pad)
        colv = jnp.logical_and(wcol >= 0, wcol < W)       # mask row wrap-around
        gm = jnp.where(colv, g, 0.0)
        acc = acc + jnp.dot(w_ref[k], gm, preferred_element_type=jnp.float32)

    om = acc + b_ref[...]
    out_ref[0:2 * KK, :] = jnp.clip(om[:2 * KK, :], -max_offset, max_offset)
    out_ref[2 * KK:3 * KK, :] = 2.0 * jax.nn.sigmoid(om[2 * KK:3 * KK, :])
    if C_om_p > 3 * KK:
        out_ref[3 * KK:, :] = om[3 * KK:, :]              # unused padding rows


def offmod_conv_pallas(x_band, w_om, b_om, *, K, pad, W, P_pad, halo,
                       max_offset):
    N, C_in_p, XW = x_band.shape
    KK = K * K
    C_om_p = w_om.shape[1]
    kernel = functools.partial(_offmod_kernel, K=K, pad=pad, W=W, P_pad=P_pad,
                               halo=halo, max_offset=max_offset)
    return pl.pallas_call(
        kernel,
        out_shape=jax.ShapeDtypeStruct((N, C_om_p, P_pad), jnp.float32),
        grid_spec=pltpu.PrefetchScalarGridSpec(
            num_scalar_prefetch=0,
            grid=(N,),
            in_specs=[
                pl.BlockSpec((None, C_in_p, XW), lambda b: (b, 0, 0)),
                pl.BlockSpec((KK, C_om_p, C_in_p), lambda b: (0, 0, 0)),
                pl.BlockSpec((C_om_p, 1), lambda b: (0, 0)),
            ],
            out_specs=pl.BlockSpec((None, C_om_p, P_pad), lambda b: (b, 0, 0)),
        ),
        compiler_params=pltpu.CompilerParams(
            dimension_semantics=("parallel",),
            vmem_limit_bytes=_VMEM_LIMIT),
    )(x_band, w_om, b_om)


# ----------------------------------------------------------------------------
# Kernel B: modulated deformable conv (torchvision deform_conv2d v2), with the
# regular-conv weight fused into the gather.
# Grid = (N, P_tiles, chunks); chunk axis is the banded/chunked HW reduction.
#   chunk == 0 : build the 4 bilinear corner indices / (modulated) weights for
#                every tap of this output tile into VMEM scratch, zero out_ref
#   every chunk: A = W_flat @ x_chunk, then for every tap k build the one-hot
#                chunk m_k with 4 compares+selects and accumulate A_k @ m_k
#                into the resident f32 output block.
# ----------------------------------------------------------------------------
def _deform_kernel(om_ref, x_ref, w_ref, out_ref, idx_ref, wgt_ref, *,
                   K, pad, H, W, C_out_p, tileP, CH, halo, compute_dtype):
    KK = K * K
    t = pl.program_id(1)
    c = pl.program_id(2)

    # ------ once per output tile: bilinear corner indices / weights ---------
    @pl.when(c == 0)
    def _():
        p_idx = t * tileP + lax.broadcasted_iota(jnp.int32, (1, tileP), 1)
        ho = p_idx // W
        wo = p_idx - ho * W
        ho_f = ho.astype(jnp.float32)
        wo_f = wo.astype(jnp.float32)
        om = om_ref[...]                                  # (C_om_p, tileP) f32
        for k in range(KK):                               # static unroll
            kh, kw = k // K, k % K
            dy = om[2 * k:2 * k + 1, :]                   # torchvision (dy,dx)
            dx = om[2 * k + 1:2 * k + 2, :]               # order, pre-clipped
            mv = om[2 * KK + k:2 * KK + k + 1, :]         # 2*sigmoid applied
            sy = ho_f + float(kh - pad) + dy
            sx = wo_f + float(kw - pad) + dx
            y0f = jnp.floor(sy)
            x0f = jnp.floor(sx)
            ly = sy - y0f
            lx = sx - x0f
            hy = 1.0 - ly
            hx = 1.0 - lx
            y0 = y0f.astype(jnp.int32)
            x0 = x0f.astype(jnp.int32)
            y1 = y0 + 1
            x1 = x0 + 1
            vy0 = jnp.logical_and(y0 >= 0, y0 < H)
            vy1 = jnp.logical_and(y1 >= 0, y1 < H)
            vx0 = jnp.logical_and(x0 >= 0, x0 < W)
            vx1 = jnp.logical_and(x1 >= 0, x1 < W)
            # OOB corners -> flat index -1 (only ever matches zero-padded cols)
            rows_i = [
                jnp.where(jnp.logical_and(vy0, vx0), y0 * W + x0, -1),
                jnp.where(jnp.logical_and(vy0, vx1), y0 * W + x1, -1),
                jnp.where(jnp.logical_and(vy1, vx0), y1 * W + x0, -1),
                jnp.where(jnp.logical_and(vy1, vx1), y1 * W + x1, -1),
            ]
            # modulator folded into the four corner weights
            rows_w = [hy * hx * mv, hy * lx * mv, ly * hx * mv, ly * lx * mv]
            for j in range(4):
                r = 4 * k + j
                idx_ref[r:r + 1, :] = rows_i[j]
                wgt_ref[r:r + 1, :] = rows_w[j].astype(wgt_ref.dtype)
        out_ref[...] = jnp.zeros_like(out_ref)

    # ------ every (tile, chunk): fused weight matmul + gather-accumulate ----
    # A[k*C_out_p + co, j] = sum_ci w_reg[co, ci, tap k] * x[ci, chunk col j]
    a = jnp.dot(w_ref[...], x_ref[...],
                preferred_element_type=jnp.float32).astype(compute_dtype)
    # original flat input-pixel index of every column of this chunk
    q = (t * tileP - halo + c * CH
         + lax.broadcasted_iota(jnp.int32, (CH, 1), 0))
    idx_all = idx_ref[...]
    wgt_all = wgt_ref[...]
    czero = jnp.zeros((), compute_dtype)

    acc = jnp.zeros((C_out_p, tileP), jnp.float32)
    for k in range(KK):                                   # static unroll
        m = None
        for j in range(4):                                # 4 bilinear corners
            r = 4 * k + j
            term = jnp.where(q == idx_all[r:r + 1, :], wgt_all[r:r + 1, :],
                             czero)
            m = term if m is None else m + term
        acc = acc + jnp.dot(a[k * C_out_p:(k + 1) * C_out_p, :], m,
                            preferred_element_type=jnp.float32)
    out_ref[...] += acc


def deform_sample_pallas(x_band, offmod, w_flat, *, K, pad, H, W, C_out_p,
                         tileP, CH, halo, P_pad, compute_dtype):
    N, C_in_p, XW = x_band.shape
    C_om_p = offmod.shape[1]
    KK = K * K
    num_t = P_pad // tileP
    num_c = (tileP + 2 * halo) // CH
    tpc = tileP // CH
    kernel = functools.partial(_deform_kernel, K=K, pad=pad, H=H, W=W,
                               C_out_p=C_out_p, tileP=tileP, CH=CH, halo=halo,
                               compute_dtype=compute_dtype)
    return pl.pallas_call(
        kernel,
        out_shape=jax.ShapeDtypeStruct((N, C_out_p, P_pad), jnp.float32),
        grid_spec=pltpu.PrefetchScalarGridSpec(
            num_scalar_prefetch=0,
            grid=(N, num_t, num_c),
            in_specs=[
                pl.BlockSpec((None, C_om_p, tileP), lambda b, t, c: (b, 0, t)),
                pl.BlockSpec((None, C_in_p, CH),
                             lambda b, t, c: (b, 0, t * tpc + c)),
                pl.BlockSpec((KK * C_out_p, C_in_p), lambda b, t, c: (0, 0)),
            ],
            out_specs=pl.BlockSpec((None, C_out_p, tileP),
                                   lambda b, t, c: (b, 0, t)),
            scratch_shapes=[pltpu.VMEM((4 * KK, tileP), jnp.int32),
                            pltpu.VMEM((4 * KK, tileP), compute_dtype)],
        ),
        compiler_params=pltpu.CompilerParams(
            dimension_semantics=("parallel", "parallel", "arbitrary"),
            vmem_limit_bytes=_VMEM_LIMIT),
    )(offmod, x_band, w_flat)


# ----------------------------------------------------------------------------
# Wrapper reproducing DeformableConv2d.forward (kernel_size=3, stride=1, pad=1,
# regular_conv bias=False -> deform_conv2d bias is None).
# compute_dtype=bf16 by default (recommended on v6e/v7x); pass jnp.float32 on
# v5e or when strict numerics are needed.  Accumulation is always f32.
# ----------------------------------------------------------------------------
def deformable_conv2d_pallas(x, params, K=3, stride=1, pad=1, tile_p=512,
                             compute_dtype=jnp.bfloat16):
    N, C_in, H, W = x.shape
    assert stride == 1 and 2 * pad == K - 1, (
        "kernel implements the module defaults: stride=1, 'same' padding")
    P = H * W
    KK = K * K
    max_offset = max(H, W) / 4.0
    reach = int(math.ceil(max_offset)) + pad + 2          # clamp-band reach (rows)
    lead = pad * (W + 1)

    C_in_p = _round_up(C_in, 8)
    C_om = 3 * KK
    C_om_p = _round_up(C_om, 8)
    w_reg = params["reg_w"]
    C_out = w_reg.shape[0]
    C_out_p = _round_up(C_out, 8)

    tileP = min(_round_up(tile_p, 128), _round_up(P, 128))
    P_pad = _round_up(P, tileP)
    halo = _round_up(reach * W, 128)                      # band half-width
    assert halo >= lead
    CH = 128                                              # reduction chunk size
    for cand in (512, 256):
        if tileP % cand == 0 and (2 * halo) % cand == 0:
            CH = cand
            break
    XW = P_pad + 2 * halo

    # single padded, channel-padded, spatially flattened x shared by both
    # kernels (pixel axis last = lane dense)
    x_cp = jnp.pad(x, ((0, 0), (0, C_in_p - C_in), (0, 0), (0, 0)))
    x_band = jnp.pad(x_cp.reshape(N, C_in_p, P),
                     ((0, 0), (0, 0), (halo, XW - halo - P)))
    x_band = x_band.astype(compute_dtype)

    # offset + modulator conv weights, tap-major; kept in f32 so the offsets /
    # modulator stay accurate even in bf16 compute mode
    w_om = jnp.concatenate([params["offset_w"], params["mod_w"]], axis=0)
    w_om = jnp.pad(w_om, ((0, C_om_p - C_om), (0, C_in_p - C_in),
                          (0, 0), (0, 0)))
    w_om = w_om.transpose(2, 3, 0, 1).reshape(KK, C_om_p, C_in_p)
    w_om = w_om.astype(jnp.float32)
    b_om = jnp.concatenate([params["offset_b"], params["mod_b"]], axis=0)
    b_om = jnp.pad(b_om, (0, C_om_p - C_om)).reshape(C_om_p, 1)
    b_om = b_om.astype(jnp.float32)

    offmod = offmod_conv_pallas(x_band, w_om, b_om, K=K, pad=pad, W=W,
                                P_pad=P_pad, halo=halo,
                                max_offset=max_offset)    # (N, C_om_p, P_pad)

    # regular conv weight, tap-major: row k*C_out_p + co <-> (tap k, out ch co)
    w_reg_p = jnp.pad(w_reg, ((0, C_out_p - C_out), (0, C_in_p - C_in),
                              (0, 0), (0, 0)))
    w_flat = w_reg_p.transpose(2, 3, 0, 1).reshape(KK * C_out_p, C_in_p)
    w_flat = w_flat.astype(compute_dtype)

    out = deform_sample_pallas(x_band, offmod, w_flat, K=K, pad=pad, H=H, W=W,
                               C_out_p=C_out_p, tileP=tileP, CH=CH, halo=halo,
                               P_pad=P_pad, compute_dtype=compute_dtype)

    return out[:, :C_out, :P].reshape(N, C_out, H, W)


# ----------------------------------------------------------------------------
# Pure-JAX reference of the full module forward (offset conv + clamp,
# 2*sigmoid modulator, torchvision-style modulated deformable conv).
# ----------------------------------------------------------------------------
def deformable_conv2d_ref(x, params, K=3, pad=1):
    N, C_in, H, W = x.shape
    max_offset = max(H, W) / 4.0
    hi = lax.Precision.HIGHEST
    w_reg = params["reg_w"]
    C_out = w_reg.shape[0]

    def conv(inp, w, b):
        y = lax.conv_general_dilated(
            inp, w, (1, 1), ((pad, pad), (pad, pad)),
            dimension_numbers=("NCHW", "OIHW", "NCHW"), precision=hi)
        return y + b[None, :, None, None]

    offset = jnp.clip(conv(x, params["offset_w"], params["offset_b"]),
                      -max_offset, max_offset)
    mask = 2.0 * jax.nn.sigmoid(conv(x, params["mod_w"], params["mod_b"]))

    ho = jnp.arange(H, dtype=jnp.float32)[None, :, None]
    wo = jnp.arange(W, dtype=jnp.float32)[None, None, :]
    n_idx = jnp.arange(N)[:, None, None, None]
    c_idx = jnp.arange(C_in)[None, :, None, None]
    out = jnp.zeros((N, C_out, H, W), jnp.float32)

    for kh in range(K):
        for kw in range(K):
            k = kh * K + kw
            sy = ho + (kh - pad) + offset[:, 2 * k]
            sx = wo + (kw - pad) + offset[:, 2 * k + 1]
            y0 = jnp.floor(sy)
            x0 = jnp.floor(sx)
            ly = sy - y0
            lx = sx - x0

            def corner(yc, xc, wgt):
                yi = yc.astype(jnp.int32)
                xi = xc.astype(jnp.int32)
                valid = (yi >= 0) & (yi < H) & (xi >= 0) & (xi < W)
                g = x[n_idx, c_idx,
                      jnp.clip(yi, 0, H - 1)[:, None],
                      jnp.clip(xi, 0, W - 1)[:, None]]
                return jnp.where(valid[:, None], g, 0.0) * wgt[:, None]

            val = (corner(y0, x0, (1 - ly) * (1 - lx))
                   + corner(y0, x0 + 1, (1 - ly) * lx)
                   + corner(y0 + 1, x0, ly * (1 - lx))
                   + corner(y0 + 1, x0 + 1, ly * lx))
            val = val * mask[:, k][:, None]
            out = out + jnp.einsum("oc,nchw->nohw", w_reg[:, :, kh, kw], val,
                                   precision=hi)
    return out


# ----------------------------------------------------------------------------
# Parameter builders
# ----------------------------------------------------------------------------
def init_params(key, C_in, C_out, K=3):
    """Mirrors the module __init__: offset/mod convs zero-initialized."""
    KK = K * K
    bound = 1.0 / float(C_in * KK) ** 0.5
    return dict(
        offset_w=jnp.zeros((2 * KK, C_in, K, K), jnp.float32),
        offset_b=jnp.zeros((2 * KK,), jnp.float32),
        mod_w=jnp.zeros((KK, C_in, K, K), jnp.float32),
        mod_b=jnp.zeros((KK,), jnp.float32),
        reg_w=jax.random.uniform(key, (C_out, C_in, K, K), jnp.float32,
                                 -bound, bound),
    )


def random_params(key, C_in, C_out, K=3):
    """Non-zero offset/modulator weights to exercise the bilinear path."""
    KK = K * K
    ks = jax.random.split(key, 5)
    bound = 1.0 / float(C_in * KK) ** 0.5
    return dict(
        offset_w=0.3 * jax.random.normal(ks[0], (2 * KK, C_in, K, K),
                                         jnp.float32),
        offset_b=0.1 * jax.random.normal(ks[1], (2 * KK,), jnp.float32),
        mod_w=0.3 * jax.random.normal(ks[2], (KK, C_in, K, K), jnp.float32),
        mod_b=0.1 * jax.random.normal(ks[3], (KK,), jnp.float32),
        reg_w=jax.random.uniform(ks[4], (C_out, C_in, K, K), jnp.float32,
                                 -bound, bound),
    )


if __name__ == "__main__":
    key = jax.random.PRNGKey(0)
    k1, k2, k3, k4 = jax.random.split(key, 4)

    # ---- test 1: module defaults (zero offsets / unit modulator), f32 -----
    N, C_in, C_out, H, W = 2, 4, 8, 16, 16
    x = jax.random.normal(k1, (N, C_in, H, W), jnp.float32)
    params = init_params(k2, C_in, C_out)

    out = jax.block_until_ready(
        deformable_conv2d_pallas(x, params, tile_p=128,
                                 compute_dtype=jnp.float32))
    assert out.shape == (N, C_out, H, W)

    ref_conv = lax.conv_general_dilated(
        x, params["reg_w"], (1, 1), ((1, 1), (1, 1)),
        dimension_numbers=("NCHW", "OIHW", "NCHW"),
        precision=lax.Precision.HIGHEST)
    err = float(jnp.max(jnp.abs(out - ref_conv)))
    assert err < 1e-3, f"zero-offset path mismatch vs plain conv: {err}"

    ref_full = deformable_conv2d_ref(x, params)
    err = float(jnp.max(jnp.abs(out - ref_full)))
    assert err < 1e-3, f"zero-offset path mismatch vs reference: {err}"

    # ---- test 2: random offsets/modulator, odd channel counts, larger image
    #              (validates bilinear/OOB path, channel padding, P tiling,
    #              band-limited multi-chunk reduction), f32 ------------------
    N2, C_in2, C_out2, H2, W2 = 1, 3, 5, 48, 48
    x2 = jax.random.normal(k3, (N2, C_in2, H2, W2), jnp.float32)
    params2 = random_params(k4, C_in2, C_out2)
    out2 = jax.block_until_ready(
        deformable_conv2d_pallas(x2, params2, tile_p=256,
                                 compute_dtype=jnp.float32))
    ref2 = deformable_conv2d_ref(x2, params2)
    err2 = float(jnp.max(jnp.abs(out2 - ref2)))
    assert err2 < 3e-3, f"deformable path mismatch vs reference: {err2}"

    # ---- test 3: default bf16 compute path (v6e/v7x recommendation) -------
    out_bf16 = jax.block_until_ready(
        deformable_conv2d_pallas(x, params, tile_p=256))
    err3 = float(jnp.max(jnp.abs(out_bf16 - ref_conv)))
    assert err3 < 5e-2, f"bf16 compute path mismatch: {err3}"

    print("KERNEL_OK")
</pallas_src>

<mosaic_0001>
module attributes {stable_mosaic.version = 11 : i64} {
  func.func @_offmod_kernel(%arg0: i32, %arg1: memref<1x8x512xf32, #tpu.memory_space<vmem>>, %arg2: memref<9x32x8xf32, #tpu.memory_space<vmem>>, %arg3: memref<32x1xf32, #tpu.memory_space<vmem>>, %arg4: memref<1x32x256xf32, #tpu.memory_space<vmem>>) attributes {dimension_semantics = [#tpu.dimension_semantics<parallel>], iteration_bounds = array<i64: 2>, scalar_prefetch = 0 : i64, scratch_operands = 0 : i64, tpu.core_type = #tpu.core_type<tc>, window_params = [{transform_indices = @transform_0, window_bounds = array<i64: 1, 8, 512>}, {pipeline_mode = #tpu.pipeline_mode<synchronous>, transform_indices = @transform_1, window_bounds = array<i64: 9, 32, 8>}, {pipeline_mode = #tpu.pipeline_mode<synchronous>, transform_indices = @transform_2, window_bounds = array<i64: 32, 1>}, {transform_indices = @transform_3, window_bounds = array<i64: 1, 32, 256>}]} {
    %0 = tpu.iota {dimensions = array<i32: 1>} : vector<1x256xi32>
    %c16_i32 = arith.constant 16 : i32
    %c0_i32 = arith.constant 0 : i32
    %1 = arith.cmpi eq, %c16_i32, %c0_i32 : i32
    %c1_i32 = arith.constant 1 : i32
    %2 = arith.select %1, %c1_i32, %c16_i32 : i32
    %3 = vector.broadcast %2 : i32 to vector<1x256xi32>
    %4 = arith.remsi %0, %3 : vector<1x256xi32>
    %c0_i32_0 = arith.constant 0 : i32
    %5 = vector.broadcast %c0_i32_0 : i32 to vector<1x256xi32>
    %6 = arith.cmpi ne, %4, %5 : vector<1x256xi32>
    %c0_i32_1 = arith.constant 0 : i32
    %7 = vector.broadcast %c0_i32_1 : i32 to vector<1x256xi32>
    %8 = arith.cmpi slt, %4, %7 : vector<1x256xi32>
    %c0_i32_2 = arith.constant 0 : i32
    %9 = arith.cmpi slt, %2, %c0_i32_2 : i32
    %10 = vector.broadcast %9 : i1 to vector<1x256xi1>
    %11 = vector.broadcast %10 : vector<1x256xi1> to vector<1x256xi1>
    %12 = arith.xori %8, %11 : vector<1x256xi1>
    %13 = arith.andi %12, %6 : vector<1x256xi1>
    %14 = vector.broadcast %2 : i32 to vector<1x256xi32>
    %15 = arith.addi %4, %14 : vector<1x256xi32>
    %16 = arith.select %13, %15, %4 : vector<1x256xi1>, vector<1x256xi32>
    %cst = arith.constant 0.000000e+00 : f32
    %17 = vector.broadcast %cst : f32 to vector<32x256xf32>
    %c0 = arith.constant 0 : index
    %c0_3 = arith.constant 0 : index
    %c111 = arith.constant 111 : index
    %18 = vector.load %arg1[%c0, %c0_3, %c111] : memref<1x8x512xf32, #tpu.memory_space<vmem>>, vector<1x8x256xf32>
    %19 = vector.shape_cast %18 : vector<1x8x256xf32> to vector<8x256xf32>
    %c-1_i32 = arith.constant -1 : i32
    %20 = vector.broadcast %c-1_i32 : i32 to vector<1x256xi32>
    %21 = arith.addi %16, %20 : vector<1x256xi32>
    %c0_i32_4 = arith.constant 0 : i32
    %22 = vector.broadcast %c0_i32_4 : i32 to vector<1x256xi32>
    %23 = arith.cmpi sge, %21, %22 : vector<1x256xi32>
    %c16_i32_5 = arith.constant 16 : i32
    %24 = vector.broadcast %c16_i32_5 : i32 to vector<1x256xi32>
    %25 = arith.cmpi slt, %21, %24 : vector<1x256xi32>
    %26 = arith.andi %23, %25 : vector<1x256xi1>
    %cst_6 = arith.constant 0.000000e+00 : f32
    %27 = vector.shape_cast %26 : vector<1x256xi1> to vector<1x256xi1>
    %28 = vector.broadcast %27 : vector<1x256xi1> to vector<8x256xi1>
    %29 = vector.broadcast %cst_6 : f32 to vector<8x256xf32>
    %30 = arith.select %28, %19, %29 : vector<8x256xi1>, vector<8x256xf32>
    %c0_7 = arith.constant 0 : index
    %c0_8 = arith.constant 0 : index
    %c0_9 = arith.constant 0 : index
    %31 = vector.load %arg2[%c0_7, %c0_8, %c0_9] : memref<9x32x8xf32, #tpu.memory_space<vmem>>, vector<1x32x8xf32>
    %32 = vector.shape_cast %31 : vector<1x32x8xf32> to vector<32x8xf32>
    %cst_10 = arith.constant dense<0.000000e+00> : vector<32x256xf32>
    %33 = tpu.matmul %32, %30, %cst_10 {dimension_numbers = #tpu.dot_dimension_numbers<[1], [0], [0], [1], [0, 0, 1, 1], [], []>} : vector<32x8xf32>, vector<8x256xf32>, vector<32x256xf32> -> vector<32x256xf32>
    %34 = arith.addf %17, %33 : vector<32x256xf32>
    %c0_11 = arith.constant 0 : index
    %c0_12 = arith.constant 0 : index
    %c112 = arith.constant 112 : index
    %35 = vector.load %arg1[%c0_11, %c0_12, %c112] : memref<1x8x512xf32, #tpu.memory_space<vmem>>, vector<1x8x256xf32>
    %36 = vector.shape_cast %35 : vector<1x8x256xf32> to vector<8x256xf32>
    %c0_i32_13 = arith.constant 0 : i32
    %37 = vector.broadcast %c0_i32_13 : i32 to vector<1x256xi32>
    %38 = arith.addi %16, %37 : vector<1x256xi32>
    %c0_i32_14 = arith.constant 0 : i32
    %39 = vector.broadcast %c0_i32_14 : i32 to vector<1x256xi32>
    %40 = arith.cmpi sge, %38, %39 : vector<1x256xi32>
    %c16_i32_15 = arith.constant 16 : i32
    %41 = vector.broadcast %c16_i32_15 : i32 to vector<1x256xi32>
    %42 = arith.cmpi slt, %38, %41 : vector<1x256xi32>
    %43 = arith.andi %40, %42 : vector<1x256xi1>
    %cst_16 = arith.constant 0.000000e+00 : f32
    %44 = vector.shape_cast %43 : vector<1x256xi1> to vector<1x256xi1>
    %45 = vector.broadcast %44 : vector<1x256xi1> to vector<8x256xi1>
    %46 = vector.broadcast %cst_16 : f32 to vector<8x256xf32>
    %47 = arith.select %45, %36, %46 : vector<8x256xi1>, vector<8x256xf32>
    %c1 = arith.constant 1 : index
    %c0_17 = arith.constant 0 : index
    %c0_18 = arith.constant 0 : index
    %48 = vector.load %arg2[%c1, %c0_17, %c0_18] : memref<9x32x8xf32, #tpu.memory_space<vmem>>, vector<1x32x8xf32>
    %49 = vector.shape_cast %48 : vector<1x32x8xf32> to vector<32x8xf32>
    %cst_19 = arith.constant dense<0.000000e+00> : vector<32x256xf32>
    %50 = tpu.matmul %49, %47, %cst_19 {dimension_numbers = #tpu.dot_dimension_numbers<[1], [0], [0], [1], [0, 0, 1, 1], [], []>} : vector<32x8xf32>, vector<8x256xf32>, vector<32x256xf32> -> vector<32x256xf32>
    %51 = arith.addf %34, %50 : vector<32x256xf32>
    %c0_20 = arith.constant 0 : index
    %c0_21 = arith.constant 0 : index
    %c113 = arith.constant 113 : index
    %52 = vector.load %arg1[%c0_20, %c0_21, %c113] : memref<1x8x512xf32, #tpu.memory_space<vmem>>, vector<1x8x256xf32>
    %53 = vector.shape_cast %52 : vector<1x8x256xf32> to vector<8x256xf32>
    %c1_i32_22 = arith.constant 1 : i32
    %54 = vector.broadcast %c1_i32_22 : i32 to vector<1x256xi32>
    %55 = arith.addi %16, %54 : vector<1x256xi32>
    %c0_i32_23 = arith.constant 0 : i32
    %56 = vector.broadcast %c0_i32_23 : i32 to vector<1x256xi32>
    %57 = arith.cmpi sge, %55, %56 : vector<1x256xi32>
    %c16_i32_24 = arith.constant 16 : i32
    %58 = vector.broadcast %c16_i32_24 : i32 to vector<1x256xi32>
    %59 = arith.cmpi slt, %55, %58 : vector<1x256xi32>
    %60 = arith.andi %57, %59 : vector<1x256xi1>
    %cst_25 = arith.constant 0.000000e+00 : f32
    %61 = vector.shape_cast %60 : vector<1x256xi1> to vector<1x256xi1>
    %62 = vector.broadcast %61 : vector<1x256xi1> to vector<8x256xi1>
    %63 = vector.broadcast %cst_25 : f32 to vector<8x256xf32>
    %64 = arith.select %62, %53, %63 : vector<8x256xi1>, vector<8x256xf32>
    %c2 = arith.constant 2 : index
    %c0_26 = arith.constant 0 : index
    %c0_27 = arith.constant 0 : index
    %65 = vector.load %arg2[%c2, %c0_26, %c0_27] : memref<9x32x8xf32, #tpu.memory_space<vmem>>, vector<1x32x8xf32>
    %66 = vector.shape_cast %65 : vector<1x32x8xf32> to vector<32x8xf32>
    %cst_28 = arith.constant dense<0.000000e+00> : vector<32x256xf32>
    %67 = tpu.matmul %66, %64, %cst_28 {dimension_numbers = #tpu.dot_dimension_numbers<[1], [0], [0], [1], [0, 0, 1, 1], [], []>} : vector<32x8xf32>, vector<8x256xf32>, vector<32x256xf32> -> vector<32x256xf32>
    %68 = arith.addf %51, %67 : vector<32x256xf32>
    %c0_29 = arith.constant 0 : index
    %c0_30 = arith.constant 0 : index
    %c127 = arith.constant 127 : index
    %69 = vector.load %arg1[%c0_29, %c0_30, %c127] : memref<1x8x512xf32, #tpu.memory_space<vmem>>, vector<1x8x256xf32>
    %70 = vector.shape_cast %69 : vector<1x8x256xf32> to vector<8x256xf32>
    %c-1_i32_31 = arith.constant -1 : i32
    %71 = vector.broadcast %c-1_i32_31 : i32 to vector<1x256xi32>
    %72 = arith.addi %16, %71 : vector<1x256xi32>
    %c0_i32_32 = arith.constant 0 : i32
    %73 = vector.broadcast %c0_i32_32 : i32 to vector<1x256xi32>
    %74 = arith.cmpi sge, %72, %73 : vector<1x256xi32>
    %c16_i32_33 = arith.constant 16 : i32
    %75 = vector.broadcast %c16_i32_33 : i32 to vector<1x256xi32>
    %76 = arith.cmpi slt, %72, %75 : vector<1x256xi32>
    %77 = arith.andi %74, %76 : vector<1x256xi1>
    %cst_34 = arith.constant 0.000000e+00 : f32
    %78 = vector.shape_cast %77 : vector<1x256xi1> to vector<1x256xi1>
    %79 = vector.broadcast %78 : vector<1x256xi1> to vector<8x256xi1>
    %80 = vector.broadcast %cst_34 : f32 to vector<8x256xf32>
    %81 = arith.select %79, %70, %80 : vector<8x256xi1>, vector<8x256xf32>
    %c3 = arith.constant 3 : index
    %c0_35 = arith.constant 0 : index
    %c0_36 = arith.constant 0 : index
    %82 = vector.load %arg2[%c3, %c0_35, %c0_36] : memref<9x32x8xf32, #tpu.memory_space<vmem>>, vector<1x32x8xf32>
    %83 = vector.shape_cast %82 : vector<1x32x8xf32> to vector<32x8xf32>
    %cst_37 = arith.constant dense<0.000000e+00> : vector<32x256xf32>
    %84 = tpu.matmul %83, %81, %cst_37 {dimension_numbers = #tpu.dot_dimension_numbers<[1], [0], [0], [1], [0, 0, 1, 1], [], []>} : vector<32x8xf32>, vector<8x256xf32>, vector<32x256xf32> -> vector<32x256xf32>
    %85 = arith.addf %68, %84 : vector<32x256xf32>
    %c0_38 = arith.constant 0 : index
    %c0_39 = arith.constant 0 : index
    %c128 = arith.constant 128 : index
    %86 = vector.load %arg1[%c0_38, %c0_39, %c128] : memref<1x8x512xf32, #tpu.memory_space<vmem>>, vector<1x8x256xf32>
    %87 = vector.shape_cast %86 : vector<1x8x256xf32> to vector<8x256xf32>
    %c0_i32_40 = arith.constant 0 : i32
    %88 = vector.broadcast %c0_i32_40 : i32 to vector<1x256xi32>
    %89 = arith.addi %16, %88 : vector<1x256xi32>
    %c0_i32_41 = arith.constant 0 : i32
    %90 = vector.broadcast %c0_i32_41 : i32 to vector<1x256xi32>
    %91 = arith.cmpi sge, %89, %90 : vector<1x256xi32>
    %c16_i32_42 = arith.constant 16 : i32
    %92 = vector.broadcast %c16_i32_42 : i32 to vector<1x256xi32>
    %93 = arith.cmpi slt, %89, %92 : vector<1x256xi32>
    %94 = arith.andi %91, %93 : vector<1x256xi1>
    %cst_43 = arith.constant 0.000000e+00 : f32
    %95 = vector.shape_cast %94 : vector<1x256xi1> to vector<1x256xi1>
    %96 = vector.broadcast %95 : vector<1x256xi1> to vector<8x256xi1>
    %97 = vector.broadcast %cst_43 : f32 to vector<8x256xf32>
    %98 = arith.select %96, %87, %97 : vector<8x256xi1>, vector<8x256xf32>
    %c4 = arith.constant 4 : index
    %c0_44 = arith.constant 0 : index
    %c0_45 = arith.constant 0 : index
    %99 = vector.load %arg2[%c4, %c0_44, %c0_45] : memref<9x32x8xf32, #tpu.memory_space<vmem>>, vector<1x32x8xf32>
    %100 = vector.shape_cast %99 : vector<1x32x8xf32> to vector<32x8xf32>
    %cst_46 = arith.constant dense<0.000000e+00> : vector<32x256xf32>
    %101 = tpu.matmul %100, %98, %cst_46 {dimension_numbers = #tpu.dot_dimension_numbers<[1], [0], [0], [1], [0, 0, 1, 1], [], []>} : vector<32x8xf32>, vector<8x256xf32>, vector<32x256xf32> -> vector<32x256xf32>
    %102 = arith.addf %85, %101 : vector<32x256xf32>
    %c0_47 = arith.constant 0 : index
    %c0_48 = arith.constant 0 : index
    %c129 = arith.constant 129 : index
    %103 = vector.load %arg1[%c0_47, %c0_48, %c129] : memref<1x8x512xf32, #tpu.memory_space<vmem>>, vector<1x8x256xf32>
    %104 = vector.shape_cast %103 : vector<1x8x256xf32> to vector<8x256xf32>
    %c1_i32_49 = arith.constant 1 : i32
    %105 = vector.broadcast %c1_i32_49 : i32 to vector<1x256xi32>
    %106 = arith.addi %16, %105 : vector<1x256xi32>
    %c0_i32_50 = arith.constant 0 : i32
    %107 = vector.broadcast %c0_i32_50 : i32 to vector<1x256xi32>
    %108 = arith.cmpi sge, %106, %107 : vector<1x256xi32>
    %c16_i32_51 = arith.constant 16 : i32
    %109 = vector.broadcast %c16_i32_51 : i32 to vector<1x256xi32>
    %110 = arith.cmpi slt, %106, %109 : vector<1x256xi32>
    %111 = arith.andi %108, %110 : vector<1x256xi1>
    %cst_52 = arith.constant 0.000000e+00 : f32
    %112 = vector.shape_cast %111 : vector<1x256xi1> to vector<1x256xi1>
    %113 = vector.broadcast %112 : vector<1x256xi1> to vector<8x256xi1>
    %114 = vector.broadcast %cst_52 : f32 to vector<8x256xf32>
    %115 = arith.select %113, %104, %114 : vector<8x256xi1>, vector<8x256xf32>
    %c5 = arith.constant 5 : index
    %c0_53 = arith.constant 0 : index
    %c0_54 = arith.constant 0 : index
    %116 = vector.load %arg2[%c5, %c0_53, %c0_54] : memref<9x32x8xf32, #tpu.memory_space<vmem>>, vector<1x32x8xf32>
    %117 = vector.shape_cast %116 : vector<1x32x8xf32> to vector<32x8xf32>
    %cst_55 = arith.constant dense<0.000000e+00> : vector<32x256xf32>
    %118 = tpu.matmul %117, %115, %cst_55 {dimension_numbers = #tpu.dot_dimension_numbers<[1], [0], [0], [1], [0, 0, 1, 1], [], []>} : vector<32x8xf32>, vector<8x256xf32>, vector<32x256xf32> -> vector<32x256xf32>
    %119 = arith.addf %102, %118 : vector<32x256xf32>
    %c0_56 = arith.constant 0 : index
    %c0_57 = arith.constant 0 : index
    %c143 = arith.constant 143 : index
    %120 = vector.load %arg1[%c0_56, %c0_57, %c143] : memref<1x8x512xf32, #tpu.memory_space<vmem>>, vector<1x8x256xf32>
    %121 = vector.shape_cast %120 : vector<1x8x256xf32> to vector<8x256xf32>
    %c-1_i32_58 = arith.constant -1 : i32
    %122 = vector.broadcast %c-1_i32_58 : i32 to vector<1x256xi32>
    %123 = arith.addi %16, %122 : vector<1x256xi32>
    %c0_i32_59 = arith.constant 0 : i32
    %124 = vector.broadcast %c0_i32_59 : i32 to vector<1x256xi32>
    %125 = arith.cmpi sge, %123, %124 : vector<1x256xi32>
    %c16_i32_60 = arith.constant 16 : i32
    %126 = vector.broadcast %c16_i32_60 : i32 to vector<1x256xi32>
    %127 = arith.cmpi slt, %123, %126 : vector<1x256xi32>
    %128 = arith.andi %125, %127 : vector<1x256xi1>
    %cst_61 = arith.constant 0.000000e+00 : f32
    %129 = vector.shape_cast %128 : vector<1x256xi1> to vector<1x256xi1>
    %130 = vector.broadcast %129 : vector<1x256xi1> to vector<8x256xi1>
    %131 = vector.broadcast %cst_61 : f32 to vector<8x256xf32>
    %132 = arith.select %130, %121, %131 : vector<8x256xi1>, vector<8x256xf32>
    %c6 = arith.constant 6 : index
    %c0_62 = arith.constant 0 : index
    %c0_63 = arith.constant 0 : index
    %133 = vector.load %arg2[%c6, %c0_62, %c0_63] : memref<9x32x8xf32, #tpu.memory_space<vmem>>, vector<1x32x8xf32>
    %134 = vector.shape_cast %133 : vector<1x32x8xf32> to vector<32x8xf32>
    %cst_64 = arith.constant dense<0.000000e+00> : vector<32x256xf32>
    %135 = tpu.matmul %134, %132, %cst_64 {dimension_numbers = #tpu.dot_dimension_numbers<[1], [0], [0], [1], [0, 0, 1, 1], [], []>} : vector<32x8xf32>, vector<8x256xf32>, vector<32x256xf32> -> vector<32x256xf32>
    %136 = arith.addf %119, %135 : vector<32x256xf32>
    %c0_65 = arith.constant 0 : index
    %c0_66 = arith.constant 0 : index
    %c144 = arith.constant 144 : index
    %137 = vector.load %arg1[%c0_65, %c0_66, %c144] : memref<1x8x512xf32, #tpu.memory_space<vmem>>, vector<1x8x256xf32>
    %138 = vector.shape_cast %137 : vector<1x8x256xf32> to vector<8x256xf32>
    %c0_i32_67 = arith.constant 0 : i32
    %139 = vector.broadcast %c0_i32_67 : i32 to vector<1x256xi32>
    %140 = arith.addi %16, %139 : vector<1x256xi32>
    %c0_i32_68 = arith.constant 0 : i32
    %141 = vector.broadcast %c0_i32_68 : i32 to vector<1x256xi32>
    %142 = arith.cmpi sge, %140, %141 : vector<1x256xi32>
    %c16_i32_69 = arith.constant 16 : i32
    %143 = vector.broadcast %c16_i32_69 : i32 to vector<1x256xi32>
    %144 = arith.cmpi slt, %140, %143 : vector<1x256xi32>
    %145 = arith.andi %142, %144 : vector<1x256xi1>
    %cst_70 = arith.constant 0.000000e+00 : f32
    %146 = vector.shape_cast %145 : vector<1x256xi1> to vector<1x256xi1>
    %147 = vector.broadcast %146 : vector<1x256xi1> to vector<8x256xi1>
    %148 = vector.broadcast %cst_70 : f32 to vector<8x256xf32>
    %149 = arith.select %147, %138, %148 : vector<8x256xi1>, vector<8x256xf32>
    %c7 = arith.constant 7 : index
    %c0_71 = arith.constant 0 : index
    %c0_72 = arith.constant 0 : index
    %150 = vector.load %arg2[%c7, %c0_71, %c0_72] : memref<9x32x8xf32, #tpu.memory_space<vmem>>, vector<1x32x8xf32>
    %151 = vector.shape_cast %150 : vector<1x32x8xf32> to vector<32x8xf32>
    %cst_73 = arith.constant dense<0.000000e+00> : vector<32x256xf32>
    %152 = tpu.matmul %151, %149, %cst_73 {dimension_numbers = #tpu.dot_dimension_numbers<[1], [0], [0], [1], [0, 0, 1, 1], [], []>} : vector<32x8xf32>, vector<8x256xf32>, vector<32x256xf32> -> vector<32x256xf32>
    %153 = arith.addf %136, %152 : vector<32x256xf32>
    %c0_74 = arith.constant 0 : index
    %c0_75 = arith.constant 0 : index
    %c145 = arith.constant 145 : index
    %154 = vector.load %arg1[%c0_74, %c0_75, %c145] : memref<1x8x512xf32, #tpu.memory_space<vmem>>, vector<1x8x256xf32>
    %155 = vector.shape_cast %154 : vector<1x8x256xf32> to vector<8x256xf32>
    %c1_i32_76 = arith.constant 1 : i32
    %156 = vector.broadcast %c1_i32_76 : i32 to vector<1x256xi32>
    %157 = arith.addi %16, %156 : vector<1x256xi32>
    %c0_i32_77 = arith.constant 0 : i32
    %158 = vector.broadcast %c0_i32_77 : i32 to vector<1x256xi32>
    %159 = arith.cmpi sge, %157, %158 : vector<1x256xi32>
    %c16_i32_78 = arith.constant 16 : i32
    %160 = vector.broadcast %c16_i32_78 : i32 to vector<1x256xi32>
    %161 = arith.cmpi slt, %157, %160 : vector<1x256xi32>
    %162 = arith.andi %159, %161 : vector<1x256xi1>
    %cst_79 = arith.constant 0.000000e+00 : f32
    %163 = vector.shape_cast %162 : vector<1x256xi1> to vector<1x256xi1>
    %164 = vector.broadcast %163 : vector<1x256xi1> to vector<8x256xi1>
    %165 = vector.broadcast %cst_79 : f32 to vector<8x256xf32>
    %166 = arith.select %164, %155, %165 : vector<8x256xi1>, vector<8x256xf32>
    %c8 = arith.constant 8 : index
    %c0_80 = arith.constant 0 : index
    %c0_81 = arith.constant 0 : index
    %167 = vector.load %arg2[%c8, %c0_80, %c0_81] : memref<9x32x8xf32, #tpu.memory_space<vmem>>, vector<1x32x8xf32>
    %168 = vector.shape_cast %167 : vector<1x32x8xf32> to vector<32x8xf32>
    %cst_82 = arith.constant dense<0.000000e+00> : vector<32x256xf32>
    %169 = tpu.matmul %168, %166, %cst_82 {dimension_numbers = #tpu.dot_dimension_numbers<[1], [0], [0], [1], [0, 0, 1, 1], [], []>} : vector<32x8xf32>, vector<8x256xf32>, vector<32x256xf32> -> vector<32x256xf32>
    %170 = arith.addf %153, %169 : vector<32x256xf32>
    %c0_83 = arith.constant 0 : index
    %c0_84 = arith.constant 0 : index
    %171 = vector.load %arg3[%c0_83, %c0_84] : memref<32x1xf32, #tpu.memory_space<vmem>>, vector<32x1xf32>
    %172 = vector.broadcast %171 : vector<32x1xf32> to vector<32x256xf32>
    %173 = arith.addf %170, %172 : vector<32x256xf32>
    %174 = vector.extract_strided_slice %173 {offsets = [0, 0], sizes = [18, 256], strides = [1, 1]} : vector<32x256xf32> to vector<18x256xf32>
    %cst_85 = arith.constant -4.000000e+00 : f32
    %cst_86 = arith.constant 4.000000e+00 : f32
    %175 = vector.broadcast %cst_85 : f32 to vector<18x256xf32>
    %176 = arith.maximumf %175, %174 : vector<18x256xf32>
    %177 = vector.broadcast %cst_86 : f32 to vector<18x256xf32>
    %178 = arith.minimumf %177, %176 : vector<18x256xf32>
    %c0_87 = arith.constant 0 : index
    %c0_88 = arith.constant 0 : index
    %c0_89 = arith.constant 0 : index
    %179 = vector.load %arg4[%c0_87, %c0_88, %c0_89] : memref<1x32x256xf32, #tpu.memory_space<vmem>>, vector<1x18x256xf32>
    %180 = vector.shape_cast %179 : vector<1x18x256xf32> to vector<18x256xf32>
    %181 = vector.shape_cast %178 : vector<18x256xf32> to vector<1x18x256xf32>
    tpu.vector_store %arg4[%c0_87, %c0_88, %c0_89], %181 {strides = array<i32>} : memref<1x32x256xf32, #tpu.memory_space<vmem>>, vector<1x18x256xf32>,
    %182 = vector.extract_strided_slice %173 {offsets = [18, 0], sizes = [9, 256], strides = [1, 1]} : vector<32x256xf32> to vector<9x256xf32>
    %183 = arith.negf %182 : vector<9x256xf32>
    %184 = math.exp %183 : vector<9x256xf32>
    %cst_90 = arith.constant 1.000000e+00 : f32
    %185 = vector.broadcast %cst_90 : f32 to vector<9x256xf32>
    %186 = arith.addf %185, %184 : vector<9x256xf32>
    %187 = arith.divf %185, %186 : vector<9x256xf32>
    %cst_91 = arith.constant 2.000000e+00 : f32
    %188 = vector.broadcast %cst_91 : f32 to vector<9x256xf32>
    %189 = arith.mulf %188, %187 : vector<9x256xf32>
    %c0_92 = arith.constant 0 : index
    %c18 = arith.constant 18 : index
    %c0_93 = arith.constant 0 : index
    %190 = vector.load %arg4[%c0_92, %c18, %c0_93] : memref<1x32x256xf32, #tpu.memory_space<vmem>>, vector<1x9x256xf32>
    %191 = vector.shape_cast %190 : vector<1x9x256xf32> to vector<9x256xf32>
    %192 = vector.shape_cast %189 : vector<9x256xf32> to vector<1x9x256xf32>
    tpu.vector_store %arg4[%c0_92, %c18, %c0_93], %192 {strides = array<i32>} : memref<1x32x256xf32, #tpu.memory_space<vmem>>, vector<1x9x256xf32>,
    %193 = vector.extract_strided_slice %173 {offsets = [27, 0], sizes = [5, 256], strides = [1, 1]} : vector<32x256xf32> to vector<5x256xf32>
    %c0_94 = arith.constant 0 : index
    %c27 = arith.constant 27 : index
    %c0_95 = arith.constant 0 : index
    %194 = vector.load %arg4[%c0_94, %c27, %c0_95] : memref<1x32x256xf32, #tpu.memory_space<vmem>>, vector<1x5x256xf32>
    %195 = vector.shape_cast %194 : vector<1x5x256xf32> to vector<5x256xf32>
    %196 = vector.shape_cast %193 : vector<5x256xf32> to vector<1x5x256xf32>
    tpu.vector_store %arg4[%c0_94, %c27, %c0_95], %196 {strides = array<i32>} : memref<1x32x256xf32, #tpu.memory_space<vmem>>, vector<1x5x256xf32>,
    return
  }
  func.func @transform_0(%arg0: i32) -> (i32, i32, i32) {
    %c0_i32 = arith.constant 0 : i32
    %c0_i32_0 = arith.constant 0 : i32
    %c0_i32_1 = arith.constant 0 : i32
    return %arg0, %c0_i32, %c0_i32_0 : i32, i32, i32
  }
  func.func @transform_1(%arg0: i32) -> (i32, i32, i32) {
    %c0_i32 = arith.constant 0 : i32
    %c0_i32_0 = arith.constant 0 : i32
    %c0_i32_1 = arith.constant 0 : i32
    %c0_i32_2 = arith.constant 0 : i32
    return %c0_i32, %c0_i32_0, %c0_i32_1 : i32, i32, i32
  }
  func.func @transform_2(%arg0: i32) -> (i32, i32) {
    %c0_i32 = arith.constant 0 : i32
    %c0_i32_0 = arith.constant 0 : i32
    %c0_i32_1 = arith.constant 0 : i32
    return %c0_i32, %c0_i32_0 : i32, i32
  }
  func.func @transform_3(%arg0: i32) -> (i32, i32, i32) {
    %c0_i32 = arith.constant 0 : i32
    %c0_i32_0 = arith.constant 0 : i32
    %c0_i32_1 = arith.constant 0 : i32
    return %arg0, %c0_i32, %c0_i32_0 : i32, i32, i32
  }
}

</mosaic_0001>

<bundles_post_ra>
// kernel: tpu_custom_call.1
= control target key start
LH: loop header
LB: loop body
LE: loop exit
PB: predicated region body
PF: predicated region fallthrough
CT: control target
= control target key end

     0   :  { %8 = vsyncpa [#allocation3], 0  ;;  %s2236_s0 = inlined_call_operand.vmem [shape: f32[2,8,512], index: 0, kind: input, shape index: {}]   ;;  %s2237_s1 = inlined_call_operand.vmem [shape: f32[9,32,8], index: 1, kind: input, shape index: {}]   ;;  %s2238_s2 = inlined_call_operand.vmem [shape: f32[32,1], index: 2, kind: input, shape index: {}]   ;;  %s2239_s3 = inlined_call_operand.hbm [shape: f32[2,32,256], index: 3, kind: output, shape index: {}]  }
   0x1   :  { %10 = vsyncpa [#allocation3 + $0x1], 0  ;;  %s1852_s12 = smov 0   ;;  %s1854_s13 = smov 0  }
   0x2   :  { %s1856_s14 = smov 0   ;;  %s1858_s15 = smov 0  }
   0x3 LB: > { %s1873_s16 = sadd.s32 4294967295, %s1818_s15   ;;  %s1518_s17 = sadd.s32 4294967294, %s1818_s15   ;;  %s1818_s15 = sphi %s1858_s15, %s2245_s15   ;;  %s1814_s14 = sphi %s1856_s14, %s2244_s14   ;;  %s1810_s13 = sphi %s1854_s13, %s2243_s13   ;;  %s1806_s12 = sphi %s1852_s12, %s2242_s12  }
   0x4   : > { %s1877_s18 = sadd.s32 1, %s1818_s15   ;;  %s91_s19 = sadd.s32 1, %s1814_s14 }
   0x5   : > { %s88_s20 = ssub.s32 %s1818_s15, %s1877_s18  ;;  %p101_p0 = scmp.ne.s32.totalorder %s1814_s14, %s1810_s13 }
   0x6   : > { %p89_p1 = scmp.eq.s32.totalorder %s88_s20, 0  ;;  %p102_p2 = scmp.eq.s32.totalorder %s1873_s16, 1 }
   0x7   : > { %p107_p3 = scmp.ne.s32.totalorder %s1810_s13, %s1806_s12  ;;  %p108_p4 = scmp.eq.s32.totalorder %s1518_s17, 1 }
   0x8   : > { %s1888_s21 = scalar_select %p89_p1, %s1814_s14, %s91_s19  }
   0x9   : > { %p1890_p5 = por %p102_p2, %p101_p0  ;;  %p1894_p6 = por %p108_p4, %p107_p3 }
   0xa   : > { %p1521_p7 = scmp.ge.s32.totalorder %s1818_s15, 1  ;;  %p140_p8 = scmp.lt.s32.totalorder %s1818_s15, 3 }
   0xc   : > { %p141_p9 = pnand %p1521_p7, %p140_p8 }
   0xd   : > { %p164_p10 = scmp.lt.s32.totalorder (!%p141_p9), %s1873_s16, 1  ;;  %v1820_v0 = vmov (!%p141_p9), 0.0   ;;  %s1821_s29 = smov (!%p141_p9), 16   ;;  %vm259_vm0 = vcmask (!%p141_p9), 64512   ;;  %v1559_v4 = vld [vmem:[%s2237_s1 + $0x80] sm:$0xff] (!%p141_p9)  ;;  %v1560_v5 = vld [vmem:[%s2237_s1 + $0x88] sm:$0xff] (!%p141_p9)  ;;  %v169_v12 = vlaneseq (!%p141_p9) }
   0xe   : > { %144 = sbr.rel (%p141_p9) target bundleno = 476 (0x1dc), region = 32  ;;  %811 = vmatprep.mubr.f32.mxu0 (!%p141_p9), %v1820_v0  ;;  %336 = vmatprep.mubr.f32.mxu1 (!%p141_p9), %v1820_v0  ;;  %s1822_s5 = smov (!%p141_p9), 127   ;;  %v1361_v7 = vld [vmem:[%s2238_s2 + $0x18] sm:$0xff] (!%p141_p9)  ;;  %v1360_v8 = vld [vmem:[%s2238_s2 + $0x10] sm:$0xff] (!%p141_p9)  ;;  %v1829_v9 = vmov (!%p141_p9), 0   ;;  %v1358_v10 = vld [vmem:[%s2238_s2] sm:$0xff] (!%p141_p9) }
   0xf   : > { %s1823_s8 = smov (!%p141_p9), 17   ;;  %s1824_s9 = smov (!%p141_p9), 113   ;;  %1739 = vset.pattern.permute.xlu1 (!%p141_p9), %v1829_v9  ;;  %1738 = vset.pattern.permute.xlu0 (!%p141_p9), %v1829_v9  ;;  %v1359_v11 = vld [vmem:[%s2238_s2 + $0x8] sm:$0xff] (!%p141_p9)  ;;  %v170_v13 = vand.u32 (!%p141_p9), 127, %v169_v12  ;;  %vm247_vm1 = vcmask (!%p141_p9), 130048   ;;  %v1525_v24 = vld [vmem:[%s2237_s1 + $0x20] sm:$0xff] (!%p141_p9) }
  0x10   : > { %s1825_s10 = smov (!%p141_p9), 15   ;;  %s1826_s11 = smov (!%p141_p9), 112   ;;  %vm856_vm2 = vcmask (!%p141_p9), 1039360   ;;  %v1526_v31 = vld [vmem:[%s2237_s1 + $0x28] sm:$0xff] (!%p141_p9)  ;;  %v1567_v32 = vld [vmem:[%s2237_s1 + $0xa0] sm:$0xff] (!%p141_p9)  ;;  %vm220_vm5 = vcmask (!%p141_p9), 138240  }
  0x11   : > { %s1827_s17 = smov (!%p141_p9), 1   ;;  %s1828_s19 = smov (!%p141_p9), 111   ;;  %v171_v14 = vadd.s32 (!%p141_p9), 128, %v170_v13  ;;  %v176_v18 = vand.u32 (!%p141_p9), 15, %v170_v13  ;;  %v1527_v37 = vld [vmem:[%s2237_s1 + $0x30] sm:$0xff] (!%p141_p9)  ;;  %v1568_v38 = vld [vmem:[%s2237_s1 + $0xa8] sm:$0xff] (!%p141_p9) }
  0x12   : > { %v1528_v42 = vld [vmem:[%s2237_s1 + $0x38] sm:$0xff] (!%p141_p9)  ;;  %v1569_v43 = vld [vmem:[%s2237_s1 + $0xb0] sm:$0xff] (!%p141_p9)  ;;  %vm983_vm8 = vcmask (!%p141_p9), 924672   ;;  %v227_v48 = vld [vmem:[%s2237_s1] sm:$0xff] (!%p141_p9)  ;;  %vm480_vm9 = vcmask (!%p141_p9), 121856   ;;  %vm1110_vm10 = vcmask (!%p141_p9), 916480  }
  0x13   : > { %v183_v15 = vand.u32 (!%p141_p9), 15, %v171_v14  ;;  %v1956_v22 = vadd.s32 (!%p141_p9), 1, %v176_v18  ;;  %v1978_v33 = vadd.s32 (!%p141_p9), 4294967295, %v176_v18  ;;  %v1570_v49 = vld [vmem:[%s2237_s1 + $0xb8] sm:$0xff] (!%p141_p9)  ;;  %v228_v53 = vld [vmem:[%s2237_s1 + $0x8] sm:$0xff] (!%p141_p9)  ;;  %v1577_v54 = vld [vmem:[%s2237_s1 + $0xc0] sm:$0xff] (!%p141_p9) }
  0x14   : > { %v229_v58 = vld [vmem:[%s2237_s1 + $0x10] sm:$0xff] (!%p141_p9)  ;;  %v1578_v59 = vld [vmem:[%s2237_s1 + $0xc8] sm:$0xff] (!%p141_p9)  ;;  %v230_v62 = vld [vmem:[%s2237_s1 + $0x18] sm:$0xff] (!%p141_p9)  ;;  %vm607_vm11 = vcmask (!%p141_p9), 7168   ;;  %vm1237_vm12 = vcmask (!%p141_p9), 908288   ;;  %s1830_s20 = smov (!%p141_p9), [#allocation2]  }
  0x15   : > { %s165_s24 = scalar_select %p164_p10, %s1873_s16, 1  ;;  %v1954_v19 = vadd.s32 1, %v183_v15  ;;  %v1962_v26 = vadd.s32 4294967295, %v183_v15  ;;  %vm466_vm4 = vcmp.lt.s32.totalorder %v1956_v22, 16  ;;  %vm201_vm7 = vcmp.ge.s32.totalorder %v1978_v33, 0  ;;  %v1579_v63 = vld [vmem:[%s2237_s1 + $0xd0] sm:$0xff] }
  0x16   : > { %v1540_v13 = vld [vmem:[%s2237_s1 + $0x48] sm:$0xff]  ;;  %v1587_v14 = vld [vmem:[%s2237_s1 + $0xe0] sm:$0xff] }
  0x17   : > { %s1620_s25 = sshll.u32 %s165_s24, 5  ;;  %vm467_vm3 = vcmp.lt.s32.totalorder %v1954_v19, 16  ;;  %vm202_vm6 = vcmp.ge.s32.totalorder %v1962_v26, 0  ;;  %v1588_v18 = vld [vmem:[%s2237_s1 + $0xe8] sm:$0xff]  ;;  %v1589_v19 = vld [vmem:[%s2237_s1 + $0xf0] sm:$0xff]  ;;  %v1549_v22 = vld [vmem:[%s2237_s1 + $0x60] sm:$0xff] }
  0x18   : > { %s168_s28 = scalar_lea.vmem %s2236_s0, %s1620_s25  ;;  %v1551_v26 = vld [vmem:[%s2237_s1 + $0x70] sm:$0xff]  ;;  %s1760_s24 = sshll.u32 %s1830_s20, 4  ;;  %s1761_s24 = int_to_ptr.vmem [resolvable:$false] %s1760_s24 }
  0x19   : > { %v1907_v1 = vld [vmem:[%s168_s28 + $0x8] sm:$0xff]  ;;  %v196_v2 = vld [vmem:[%s168_s28] sm:$0xff]  ;;  %v1912_v3 = vld [vmem:[%s168_s28 + $0x10] sm:$0xff]  ;;  %s1762_s25 = scalar_lea.vmem %s1761_s24, 2048 }
  0x1a   : > { %243 = vrot.lane.b32.xlu0 %v1907_v1, %s1821_s29  ;;  %241 = vrot.lane.b32.xlu1 %v196_v2, %s1821_s29  ;;  %v846_v6 = vld [vmem:[%s168_s28 + $0x18] sm:$0xff] }
  0x1b   : > { %747 = vmatprep.subr.mxu0 %v1912_v3 }
  0x1c   : > { %748 = vmatpush1.msra.mxu0 %v1907_v1 }
  0x1d   : > { %1563 = vmatmul.mubr.msk.f32.vlgmr.msra.gmra.mrb[0].mxu0 %vm259_vm0, %v1559_v4 }
  0x1e   : > { %245 = vrot.lane.b32.xlu0 %v1912_v3, %s1821_s29  ;;  %852 = vrot.lane.b32.xlu1 %v1912_v3, %s1822_s5 }
  0x1f   : > { %817 = vmatprep.mubr.f32.mxu0 %v1820_v0 }
  0x21   : > { %1564 = vmatmul.mubr.msk.f32.gmra.mrb[2].mxu0 %vm259_vm0, %v1560_v5 }
  0x22   : > { %854 = vrot.lane.b32.xlu0 %v846_v6, %s1822_s5  ;;  %850 = vrot.lane.b32.xlu1 %v1907_v1, %s1822_s5  ;;  %s161_s5 = sand.u32 1, %s1810_s13  }
  0x23   : > { %944 = vmatprep.mubr.f32.mxu0 %v1820_v0  ;;  %s1522_s6 = sshll.u32 %s161_s5, 6 }
  0x24   : > { %s2169_s7 = scalar_lea.vmem [#allocation2], %s1522_s6 }
  0x26   : > { %216 = vrot.lane.b32.xlu0 %v1907_v1, %s1823_s8  ;;  %218 = vrot.lane.b32.xlu1 %v1912_v3, %s1823_s8 }
  0x2a   : > { %214 = vrot.lane.b32.xlu0 %v196_v2, %s1823_s8  ;;  %979 = vrot.lane.b32.xlu1 %v1912_v3, %s1824_s9  ;;  %s1621_s8 = sshll.u32 %s1873_s16, 10  ;;  %s2194_s16 = scalar_lea.sflag [#allocation3], %s161_s5 }
  0x2e   : > { %981 = vrot.lane.b32.xlu0 %v846_v6, %s1824_s9  ;;  %977 = vrot.lane.b32.xlu1 %v1907_v1, %s1824_s9  ;;  %s1456_s9 = sshll.u32 %s2169_s7, 4  ;;  %s2188_s9 = int_to_ptr.vmem [resolvable:$true] %s1456_s9 }
  0x2f   : > { %p1763_p0 = scmp.lt.s32.totalorder %s2188_s9, %s1761_s24 }
  0x32   : > { %476 = vrot.lane.b32.xlu0 %v1907_v1, %s1825_s10  ;;  %478 = vrot.lane.b32.xlu1 %v1912_v3, %s1825_s10 }
  0x36   : > { %474 = vrot.lane.b32.xlu0 %v196_v2, %s1825_s10  ;;  %1106 = vrot.lane.b32.xlu1 %v1912_v3, %s1826_s11 }
  0x3a   : > { %1108 = vrot.lane.b32.xlu0 %v846_v6, %s1826_s11  ;;  %1104 = vrot.lane.b32.xlu1 %v1907_v1, %s1826_s11 }
  0x3e   : > { %603 = vrot.lane.b32.xlu0 %v1907_v1, %s1827_s17  ;;  %605 = vrot.lane.b32.xlu1 %v1912_v3, %s1827_s17 }
  0x42   : > { %601 = vrot.lane.b32.xlu0 %v196_v2, %s1827_s17  ;;  %1233 = vrot.lane.b32.xlu1 %v1912_v3, %s1828_s19  ;;  %s2186_s17 = scalar_lea.hbm %s2239_s3, %s1621_s8 }
  0x46   : > { %1235 = vrot.lane.b32.xlu0 %v846_v6, %s1828_s19  ;;  %1231 = vrot.lane.b32.xlu1 %v1907_v1, %s1828_s19  ;;  %s1756_s19 = scalar_lea.vmem %s2188_s9, 1024 }
  0x47   : > { %p1757_p11 = scmp.ne.s32.totalorder %s2188_s9, %s1756_s19  ;;  %p1764_p1 = scmp.lt.s32.totalorder %s1762_s25, %s1756_s19 }
  0x49   : > { %p1758_p12 = pnand %p1757_p11, %p1890_p5  ;;  %p1765_p2 = por %p1764_p1, %p1763_p0 }
  0x4a   : > { %1379 = vperm.xlu1 %1739, %v1361_v7   ;;  %1374 = vperm.xlu0 %1738, %v1360_v8   ;;  %v1539_v7 = vld [vmem:[%s2237_s1 + $0x40] sm:$0xff]  ;;  %v1580_v8 = vld [vmem:[%s2237_s1 + $0xd8] sm:$0xff] }
  0x4b   : > { %p1759_p13 = pneg %p1758_p12 }
  0x4d   : > { %p1766_p3 = pnand %p1765_p2, %p1759_p13 }
  0x4e   : > { %1364 = vperm.xlu1 %1739, %v1358_v10   ;;  %1369 = vperm.xlu0 %1738, %v1359_v11  }
  0x8c   : > { %v244_v16 = vpop.permute.xlu0 %243  ;;  %v242_v17 = vpop.permute.xlu1 %241 }
  0x8d   : > { %v248_v25 = vsel %vm247_vm1, %v242_v17, %v244_v16  ;;  %v1541_v17 = vld [vmem:[%s2237_s1 + $0x50] sm:$0xff] }
  0x90   : > { %v246_v20 = vpop.permute.xlu0 %245  ;;  %v853_v21 = vpop.permute.xlu1 %852 }
  0x91   : > { %v249_v23 = vsel %vm247_vm1, %v244_v16, %v246_v20 }
  0x92   : > { %272 = vmatprep.subr.mxu1 %v249_v23  ;;  %v1590_v23 = vld [vmem:[%s2237_s1 + $0xf8] sm:$0xff] }
  0x93   : > { %273 = vmatpush1.msra.mxu1 %v248_v25  ;;  %v1595_v25 = vld [vmem:[%s2237_s1 + $0x100] sm:$0xff] }
  0x94   : > { %v855_v27 = vpop.permute.xlu0 %854  ;;  %1529 = vmatmul.mubr.msk.f32.vlgmr.msra.gmra.mrb[0].mxu1 %vm259_vm0, %v1525_v24  ;;  %v851_v28 = vpop.permute.xlu1 %850  ;;  %v1550_v24 = vld [vmem:[%s2237_s1 + $0x68] sm:$0xff] }
  0x95   : > { %v858_v29 = vsel %vm856_vm2, %v853_v21, %v855_v27  ;;  %v857_v30 = vsel %vm856_vm2, %v851_v28, %v853_v21  ;;  %342 = vmatprep.mubr.f32.mxu1 %v1820_v0  ;;  %v1542_v21 = vld [vmem:[%s2237_s1 + $0x58] sm:$0xff]  ;;  %v1596_v27 = vld [vmem:[%s2237_s1 + $0x108] sm:$0xff]  ;;  %v1597_v28 = vld [vmem:[%s2237_s1 + $0x110] sm:$0xff] }
  0x96   : > { %1571 = vmatprep.subr.msk.mxu0 %vm467_vm3, %v858_v29  ;;  %v1561_v29 = vld [vmem:[%s2237_s1 + $0x90] sm:$0xff] }
  0x97   : > { %1572 = vmatpush1.msk.msra.mxu0 %vm466_vm4, %v857_v30  ;;  %v1598_v30 = vld [vmem:[%s2237_s1 + $0x118] sm:$0xff] }
  0x98   : > { %v217_v34 = vpop.permute.xlu0 %216  ;;  %1530 = vmatmul.mubr.msk.f32.gmra.mrb[2].mxu1 %vm259_vm0, %v1526_v31  ;;  %1573 = vmatmul.mubr.msk.f32.vlgmr.msra.gmra.mrb[0].mxu0 %vm259_vm0, %v1567_v32  ;;  %v219_v35 = vpop.permute.xlu1 %218  ;;  %v1562_v31 = vld [vmem:[%s2237_s1 + $0x98] sm:$0xff] }
  0x99   : > { %v222_v36 = vsel %vm220_vm5, %v217_v34, %v219_v35  ;;  %348 = vmatprep.mubr.f32.mxu1 %v1820_v0  ;;  %950 = vmatprep.mubr.f32.mxu0 %v1820_v0 }
  0x9a   : > { %1533 = vmatprep.subr.msk.mxu1 %vm202_vm6, %v222_v36 }
  0x9c   : > { %v215_v39 = vpop.permute.xlu0 %214  ;;  %1531 = vmatmul.mubr.msk.f32.gmra.mrb[4].mxu1 %vm259_vm0, %v1527_v37  ;;  %1574 = vmatmul.mubr.msk.f32.gmra.mrb[2].mxu0 %vm259_vm0, %v1568_v38  ;;  %v980_v40 = vpop.permute.xlu1 %979 }
  0x9d   : > { %v221_v41 = vsel %vm220_vm5, %v215_v39, %v217_v34  ;;  %354 = vmatprep.mubr.f32.mxu1 %v1820_v0  ;;  %956 = vmatprep.mubr.f32.mxu0 %v1820_v0 }
  0x9e   : > { %1534 = vmatpush1.msk.msra.mxu1 %vm201_vm7, %v221_v41 }
  0xa0   : > { %v982_v44 = vpop.permute.xlu0 %981  ;;  %1532 = vmatmul.mubr.msk.f32.gmra.mrb[6].mxu1 %vm259_vm0, %v1528_v42  ;;  %1575 = vmatmul.mubr.msk.f32.gmra.mrb[4].mxu0 %vm259_vm0, %v1569_v43  ;;  %v978_v45 = vpop.permute.xlu1 %977 }
  0xa1   : > { %v985_v46 = vsel %vm983_vm8, %v980_v40, %v982_v44  ;;  %v984_v47 = vsel %vm983_vm8, %v978_v45, %v980_v40  ;;  %437 = vmatprep.mubr.f32.mxu1 %v1820_v0  ;;  %962 = vmatprep.mubr.f32.mxu0 %v1820_v0 }
  0xa2   : > { %1581 = vmatprep.subr.msk.mxu0 %vm202_vm6, %v985_v46 }
  0xa3   : > { %1582 = vmatpush1.msk.msra.mxu0 %vm201_vm7, %v984_v47 }
  0xa4   : > { %v477_v50 = vpop.permute.xlu0 %476  ;;  %1535 = vmatmul.mubr.msk.f32.vlgmr.msra.gmra.mrb[0].mxu1 %vm259_vm0, %v227_v48  ;;  %1576 = vmatmul.mubr.msk.f32.gmra.mrb[6].mxu0 %vm259_vm0, %v1570_v49  ;;  %v479_v51 = vpop.permute.xlu1 %478 }
  0xa5   : > { %443 = vmatprep.mubr.f32.mxu1 %v1820_v0  ;;  %1071 = vmatprep.mubr.f32.mxu0 %v1820_v0  ;;  %v482_v52 = vsel %vm480_vm9, %v477_v50, %v479_v51 }
  0xa6   : > { %1543 = vmatprep.subr.msk.mxu1 %vm467_vm3, %v482_v52 }
  0xa8   : > { %v475_v55 = vpop.permute.xlu0 %474  ;;  %1536 = vmatmul.mubr.msk.f32.gmra.mrb[2].mxu1 %vm259_vm0, %v228_v53  ;;  %1583 = vmatmul.mubr.msk.f32.vlgmr.msra.gmra.mrb[0].mxu0 %vm259_vm0, %v1577_v54  ;;  %v1107_v56 = vpop.permute.xlu1 %1106 }
  0xa9   : > { %v481_v57 = vsel %vm480_vm9, %v475_v55, %v477_v50  ;;  %449 = vmatprep.mubr.f32.mxu1 %v1820_v0  ;;  %1077 = vmatprep.mubr.f32.mxu0 %v1820_v0 }
  0xaa   : > { %1544 = vmatpush1.msk.msra.mxu1 %vm466_vm4, %v481_v57 }
  0xac   : > { %1537 = vmatmul.mubr.msk.f32.gmra.mrb[4].mxu1 %vm259_vm0, %v229_v58  ;;  %1584 = vmatmul.mubr.msk.f32.gmra.mrb[2].mxu0 %vm259_vm0, %v1578_v59  ;;  %v1109_v60 = vpop.permute.xlu0 %1108  ;;  %v1105_v61 = vpop.permute.xlu1 %1104 }
  0xad   : > { %455 = vmatprep.mubr.f32.mxu1 %v1820_v0  ;;  %1083 = vmatprep.mubr.f32.mxu0 %v1820_v0  ;;  %v1111_v2 = vsel %vm1110_vm10, %v1105_v61, %v1107_v56  ;;  %v1112_v4 = vsel %vm1110_vm10, %v1107_v56, %v1109_v60 }
  0xae   : > { %1134 = vmatprep.subr.mxu0 %v1112_v4 }
  0xaf   : > { %1135 = vmatpush1.msra.mxu0 %v1111_v2 }
  0xb0   : > { %1538 = vmatmul.mubr.msk.f32.gmra.mrb[6].mxu1 %vm259_vm0, %v230_v62  ;;  %1585 = vmatmul.mubr.msk.f32.gmra.mrb[4].mxu0 %vm259_vm0, %v1579_v63  ;;  %v604_v5 = vpop.permute.xlu0 %603  ;;  %v606_v6 = vpop.permute.xlu1 %605 }
  0xb1   : > { %568 = vmatprep.mubr.f32.mxu1 %v1820_v0  ;;  %1089 = vmatprep.mubr.f32.mxu0 %v1820_v0  ;;  %v609_v9 = vsel %vm607_vm11, %v604_v5, %v606_v6 }
  0xb2   : > { %1553 = vmatprep.subr.msk.mxu1 %vm202_vm6, %v609_v9 }
  0xb4   : > { %1545 = vmatmul.mubr.msk.f32.vlgmr.msra.gmra.mrb[0].mxu1 %vm259_vm0, %v1539_v7  ;;  %1586 = vmatmul.mubr.msk.f32.gmra.mrb[6].mxu0 %vm259_vm0, %v1580_v8  ;;  %v602_v10 = vpop.permute.xlu0 %601  ;;  %v1234_v11 = vpop.permute.xlu1 %1233 }
  0xb5   : > { %574 = vmatprep.mubr.f32.mxu1 %v1820_v0  ;;  %1198 = vmatprep.mubr.f32.mxu0 %v1820_v0  ;;  %v608_v12 = vsel %vm607_vm11, %v602_v10, %v604_v5 }
  0xb6   : > { %1554 = vmatpush1.msk.msra.mxu1 %vm201_vm7, %v608_v12 }
  0xb7   : > { %1622 = vmatprep.subr.mxu1 %v1912_v3 }
  0xb8   : > { %1546 = vmatmul.mubr.msk.f32.gmra.mrb[2].mxu1 %vm259_vm0, %v1540_v13  ;;  %1591 = vmatmul.mubr.msk.f32.vlgmr.msra.gmra.mrb[0].mxu0 %vm259_vm0, %v1587_v14  ;;  %v1236_v15 = vpop.permute.xlu0 %1235  ;;  %v1232_v16 = vpop.permute.xlu1 %1231 }
  0xb9   : > { %580 = vmatprep.mubr.f32.mxu1 %v1820_v0  ;;  %1204 = vmatprep.mubr.f32.mxu0 %v1820_v0  ;;  %v1239_v20 = vsel %vm1237_vm12, %v1234_v11, %v1236_v15  ;;  %v1238_v3 = vsel %vm1237_vm12, %v1232_v16, %v1234_v11 }
  0xba   : > { %1599 = vmatprep.subr.msk.mxu0 %vm467_vm3, %v1239_v20 }
  0xbb   : > { %1600 = vmatpush1.msk.msra.mxu0 %vm466_vm4, %v1238_v3 }
  0xbc   : > { %1547 = vmatmul.mubr.msk.f32.gmra.mrb[4].mxu1 %vm259_vm0, %v1541_v17  ;;  %1592 = vmatmul.mubr.msk.f32.gmra.mrb[2].mxu0 %vm259_vm0, %v1588_v18 }
  0xbd   : > { %586 = vmatprep.mubr.f32.mxu1 %v1820_v0  ;;  %1210 = vmatprep.mubr.f32.mxu0 %v1820_v0 }
  0xc0   : > { %1548 = vmatmul.mubr.msk.f32.gmra.mrb[6].mxu1 %vm259_vm0, %v1542_v21  ;;  %1593 = vmatmul.mubr.msk.f32.gmra.mrb[4].mxu0 %vm259_vm0, %v1589_v19 }
  0xc1   : > { %695 = vmatprep.mubr.f32.mxu1 %v1820_v0  ;;  %1216 = vmatprep.mubr.f32.mxu0 %v1820_v0 }
  0xc4   : > { %1555 = vmatmul.mubr.msk.f32.vlgmr.msra.gmra.mrb[0].mxu1 %vm259_vm0, %v1549_v22  ;;  %1594 = vmatmul.mubr.msk.f32.gmra.mrb[6].mxu0 %vm259_vm0, %v1590_v23 }
  0xc5   : > { %701 = vmatprep.mubr.f32.mxu1 %v1820_v0  ;;  %1325 = vmatprep.mubr.f32.mxu0 %v1820_v0 }
  0xc6   : > { %1623 = vmatpush1.msra.mxu1 %v1907_v1  ;;  %v1552_v1 = vld [vmem:[%s2237_s1 + $0x78] sm:$0xff] }
  0xc8   : > { %1556 = vmatmul.mubr.msk.f32.gmra.mrb[2].mxu1 %vm259_vm0, %v1550_v24  ;;  %1601 = vmatmul.mubr.msk.f32.vlgmr.msra.gmra.mrb[0].mxu0 %vm259_vm0, %v1595_v25 }
  0xc9   : > { %707 = vmatprep.mubr.f32.mxu1 %v1820_v0  ;;  %1331 = vmatprep.mubr.f32.mxu0 %v1820_v0  ;;  %v1380_v32 = vpop.permute.xlu1 %1379  ;;  %v1375_v35 = vpop.permute.xlu0 %1374 }
  0xcc   : > { %1557 = vmatmul.mubr.msk.f32.gmra.mrb[4].mxu1 %vm259_vm0, %v1551_v26  ;;  %1602 = vmatmul.mubr.msk.f32.gmra.mrb[2].mxu0 %vm259_vm0, %v1596_v27 }
  0xcd   : > { %713 = vmatprep.mubr.f32.mxu1 %v1820_v0  ;;  %1337 = vmatprep.mubr.f32.mxu0 %v1820_v0  ;;  %v1365_v36 = vpop.permute.xlu1 %1364  ;;  %v1370_v45 = vpop.permute.xlu0 %1369 }
  0xd0   : > { %1558 = vmatmul.mubr.msk.f32.gmra.mrb[6].mxu1 %vm259_vm0, %v1552_v1  ;;  %1603 = vmatmul.mubr.msk.f32.gmra.mrb[4].mxu0 %vm259_vm0, %v1597_v28 }
  0xd1   : > { %823 = vmatprep.mubr.f32.mxu1 %v1820_v0  ;;  %1343 = vmatprep.mubr.f32.mxu0 %v1820_v0 }
  0xd4   : > { %1565 = vmatmul.mubr.msk.f32.vlgmr.msra.gmra.mrb[4].mxu1 %vm259_vm0, %v1561_v29  ;;  %1604 = vmatmul.mubr.msk.f32.gmra.mrb[6].mxu0 %vm259_vm0, %v1598_v30 }
  0xd5   : > { %829 = vmatprep.mubr.f32.mxu1 %v1820_v0 }
  0xd8   : > { %1566 = vmatmul.mubr.msk.f32.gmra.mrb[6].mxu1 %vm259_vm0, %v1562_v31 }
 0x197   : > { %v697_v33 = vpop.f32.mrb[0].mxu1 }
 0x198   : > { %v699_v34 = vpop.f32.mrb[1].mxu1 }
 0x19b   : > { %v703_v37 = vpop.f32.mrb[2].mxu1  ;;  %v1327_v38 = vpop.f32.mrb[0].mxu0 }
 0x19c   : > { %v1624_v39 = vadd.f32 %v1327_v38, %v697_v33  ;;  %v705_v40 = vpop.f32.mrb[3].mxu1  ;;  %v1329_v41 = vpop.f32.mrb[1].mxu0 }
 0x19d   : > { %v1625_v0 = vadd.f32 %v1329_v41, %v699_v34 }
 0x19e   : > { %v1382_v42 = vadd.f32 %v1624_v39, %v1365_v36 }
 0x19f   : > { %v1383_v43 = vadd.f32 %v1625_v0, %v1365_v36  ;;  %v1333_v44 = vpop.f32.mrb[2].mxu0 }
 0x1a0   : > { %v1605_v46 = vclamps-f32 %v1382_v42, 4.0  ;;  %v1626_v47 = vadd.f32 %v1333_v44, %v703_v37  ;;  %v1335_v48 = vpop.f32.mrb[3].mxu0 }
 0x1a1   : > { %v1606_v49 = vclamps-f32 %v1383_v43, 4.0  ;;  %v1627_v50 = vadd.f32 %v1335_v48, %v705_v40 }
 0x1a2   : > { %1402 = vst [vmem:[%s2169_s7] sm:$0xff] %v1605_v46  ;;  %v1384_v51 = vadd.f32 %v1626_v47, %v1370_v45 }
 0x1a3   : > { %1403 = vst [vmem:[%s2169_s7 + $0x8] sm:$0xff] %v1606_v49  ;;  %v1385_v52 = vadd.f32 %v1627_v50, %v1370_v45  ;;  %v1339_v53 = vpop.f32.mrb[4].mxu0 }
 0x1a4   : > { %v1607_v54 = vclamps-f32 %v1384_v51, 4.0  ;;  %v1341_v55 = vpop.f32.mrb[5].mxu0 }
 0x1a5   : > { %v1608_v56 = vclamps-f32 %v1385_v52, 4.0 }
 0x1a6   : > { %1404 = vst [vmem:[%s2169_s7 + $0x10] sm:$0xff] %v1607_v54 }
 0x1a7   : > { %1405 = vst [vmem:[%s2169_s7 + $0x18] sm:$0xff] %v1608_v56  ;;  %v825_v57 = vpop.f32.mrb[4].mxu1  ;;  %v1345_v58 = vpop.f32.mrb[6].mxu0 }
 0x1a8   : > { %v1628_v59 = vadd.f32 %v1339_v53, %v825_v57  ;;  %v827_v60 = vpop.f32.mrb[5].mxu1  ;;  %v1347_v61 = vpop.f32.mrb[7].mxu0 }
 0x1a9   : > { %v1629_v62 = vadd.f32 %v1341_v55, %v827_v60 }
 0x1aa   : > { %v1386_v63 = vadd.f32 %v1628_v59, %v1375_v35 }
 0x1ab   : > { %v1387_v2 = vadd.f32 %v1629_v62, %v1375_v35  ;;  %v831_v4 = vpop.f32.mrb[6].mxu1 }
 0x1ac   : > { %v1609_v5 = vclamps-f32 %v1386_v63, 4.0  ;;  %v1611_v6 = vmul.f32 -1.442695, %v1386_v63  ;;  %v1630_v7 = vadd.f32 %v1345_v58, %v831_v4  ;;  %v833_v8 = vpop.f32.mrb[7].mxu1 }
 0x1ad   : > { %v1610_v9 = vclamps-f32 %v1387_v2, 4.0  ;;  %v1612_v10 = vmul.f32 -1.442695, %v1387_v2  ;;  %v1631_v11 = vadd.f32 %v1347_v61, %v833_v8 }
 0x1ae   : > { %1406 = vst [vmem:[%s2169_s7 + $0x20] sm:$0x3] %v1609_v5  ;;  %1740 = vpow2.f32 %v1611_v6  ;;  %v1388_v12 = vadd.f32 %v1630_v7, %v1380_v32 }
 0x1af   : > { %1407 = vst [vmem:[%s2169_s7 + $0x28] sm:$0x3] %v1610_v9  ;;  %1742 = vpow2.f32 %v1612_v10  ;;  %v1389_v13 = vadd.f32 %v1631_v11, %v1380_v32 }
 0x1b0   : > { %v1613_v14 = vmul.f32 -1.442695, %v1388_v12  ;;  %1440 = vst [vmem:[%s2169_s7 + $0x30] sm:$0xf8] %v1388_v12 }
 0x1b1   : > { %v1614_v15 = vmul.f32 -1.442695, %v1389_v13  ;;  %1441 = vst [vmem:[%s2169_s7 + $0x38] sm:$0xf8] %v1389_v13 }
 0x1b2   : > { %1744 = vpow2.f32 %v1613_v14 }
 0x1b3   : > { %1746 = vpow2.f32 %v1614_v15 }
 0x1b8   : > { %v1741_v16 = vpop.eup %1740 }
 0x1b9   : > { %v1743_v17 = vpop.eup %1742  ;;  %v1420_v18 = vadd.f32 1.0, %v1741_v16 }
 0x1ba   : > { %v1421_v20 = vadd.f32 1.0, %v1743_v17 }
 0x1bb   : > { %1748 = vrcp.f32 %v1420_v18 }
 0x1bc   : > { %v1745_v3 = vpop.eup %1744  ;;  %1750 = vrcp.f32 %v1421_v20 }
 0x1bd   : > { %v1747_v21 = vpop.eup %1746  ;;  %v1422_v19 = vadd.f32 1.0, %v1745_v3 }
 0x1be   : > { %v1423_v22 = vadd.f32 1.0, %v1747_v21 }
 0x1bf   : > { %1752 = vrcp.f32 %v1422_v19 }
 0x1c0   : > { %1754 = vrcp.f32 %v1423_v22 }
 0x1c5   : > { %v1749_v23 = vpop.eup %1748 }
 0x1c6   : > { %v1751_v24 = vpop.eup %1750  ;;  %v1432_v25 = vmul.f32 2.0, %v1749_v23 }
 0x1c7   : > { %v1433_v26 = vmul.f32 2.0, %v1751_v24 }
 0x1c8   : > { %1436 = vst [vmem:[%s2169_s7 + $0x20] sm:$0xfc] %v1432_v25 }
 0x1c9   : > { %v1753_v27 = vpop.eup %1752  ;;  %1437 = vst [vmem:[%s2169_s7 + $0x28] sm:$0xfc] %v1433_v26 }
 0x1ca   : > { %v1755_v1 = vpop.eup %1754  ;;  %v1434_v28 = vmul.f32 2.0, %v1753_v27 }
 0x1cb   : > { %v1435_v29 = vmul.f32 2.0, %v1755_v1 }
 0x1cc   : > { %1438 = vst [vmem:[%s2169_s7 + $0x30] sm:$0x7] %v1434_v28 }
 0x1cd   : > { %1439 = vst [vmem:[%s2169_s7 + $0x38] sm:$0x7] %v1435_v29 }
 0x1ce   : > { %1769 = shalt.err (!%p1766_p3)
}
 0x1cf   : > { %s1770_s26 = scalar_lea.hbm %s2186_s17, 1024  ;;  %s1774_s30 = scalar_lea.hbm %s2239_s3, 2048 }
 0x1d0   : > { %p1771_p4 = scmp.ne.s32.totalorder %s2186_s17, %s1770_s26  ;;  %p1775_p9 = scmp.lt.u32.totalorder %s2186_s17, %s2239_s3 }
 0x1d1   : > { %p1776_p10 = scmp.lt.u32.totalorder %s1774_s30, %s1770_s26  ;;  %p1778_p12 = scmp.lt.u32.totalorder %s1770_s26, %s2186_s17 }
 0x1d2   : > { %p1772_p7 = pnand %p1771_p4, %p1890_p5 }
 0x1d3   : > { %p1777_p11 = por %p1776_p10, %p1775_p9 }
 0x1d4   : > { %p1773_p8 = pneg %p1772_p7 }
 0x1d5   : > { %p1779_p13 = por %p1778_p12, %p1777_p11 }
 0x1d7   : > { %p1780_p0 = pnand %p1779_p13, %p1773_p8 }
 0x1d9   : > { %1783 = shalt.err (!%p1780_p0)
}
 0x1da   : > { %s1831_s6 = smov 256  }
 0x1db   : > { %1688 = dma.vmem_to_hbm [thread:$0]  (%p1890_p5), %s2188_s9, 1024, %s2186_s17, %s2194_s16, %s1831_s6, %s1831_s6, %s1821_s29  }
 0x1dc PF: > { %p1694_p1 = scmp.ge.s32.totalorder %s1818_s15, 2  ;;  %s1471_s7 = sand.u32 1, %s1806_s12  }
 0x1dd   : > { %s1472_s8 = scalar_lea.sflag [#allocation3], %s1471_s7 }
 0x1de   : > { %p1691_p2 = pnand %p1694_p1, %p1894_p6 }
 0x1e0   : > { %1801 = dma.done.wait (!%p1691_p2), %s1472_s8, 1024  }
 0x1e1   : > { %1803 = vsyncadd (!%p1691_p2), %s1472_s8, 4294966272  ;;  %p13_p3 = scmp.ge.s32.totalorder %s1877_s18, 4   ;;  %s2242_s12 = smov %s1810_s13 }
 0x1e2   : > { %s2243_s13 = smov %s1814_s14  ;;  %s2244_s14 = smov %s1888_s21 }
 0x1e3   : > { %s2245_s15 = smov %s1877_s18  ;;  %15 = sbr.rel (!%p13_p3) target bundleno = 3 (0x3), region = 75 }
 0x1ea   :  { %1477 = vsyncpa [#allocation3], 1 }
 0x1eb   :  { %1479 = vsyncpa [#allocation3 + $0x1], 1 }

</bundles_post_ra>
